<compile_context>
chip_gen: v5e
topology: v5e:2x2
jax: 0.10.0
libtpu: 0.0.40
codegen_flags: <defaults>
</compile_context>

<pallas_src>
import numpy as np

import jax
import jax.numpy as jnp
from jax.experimental import pallas as pl
from jax.experimental.pallas import tpu as pltpu

# ----- model hyperparameters (small, consistent with the module) -----
D_MODEL = 32
D_K = 8
D_V = 8
N_HEADS = 4
BATCH = 2
SEQ = 8
LN_EPS = 1e-5


def mha_kernel(xqkv_ref, bias_ref, wqkv_ref, bqkv_ref, wo_ref, small_ref, out_ref):
    """One grid step == one batch element.

    xqkv_ref : [1, 3, S, D]    stacked (Q, K, V) inputs for this batch element
    bias_ref : [1, S, S]       additive attention-mask bias (0 / -1e9)
    wqkv_ref : [3*H, D, d_k]   per-head projection weights (W_Q pre-scaled by 1/sqrt(d_k))
    bqkv_ref : [3*H, 1, d_k]   per-head projection biases  (b_Q pre-scaled)
    wo_ref   : [H, d_v, D]     output projection weights, head-major
    small_ref: [3, D]          rows: b_O, gamma, beta
    out_ref  : [1, S, D]
    """
    H = N_HEADS
    _, S, D = out_ref.shape

    x3 = xqkv_ref[0]                        # [3, S, D]
    q_in = x3[0]                            # [S, D]  (residual)

    # Fused Q/K/V projection: ONE batched matmul over n = (qkv, head).
    # The per-batch-element broadcast over heads touches leading dims only
    # (no lane/sublane relayout); weights are NOT replicated anywhere.
    xh = jnp.broadcast_to(x3[:, None], (3, H, S, D)).reshape(3 * H, S, D)
    qkv = jnp.einsum('nsd,nde->nse', xh, wqkv_ref[...],
                     preferred_element_type=jnp.float32) + bqkv_ref[...]
    q_h = qkv[0:H]                          # [H, S, d_k]  (scale folded into W_Q/b_Q)
    k_h = qkv[H:2 * H]                      # [H, S, d_k]
    v_h = qkv[2 * H:3 * H]                  # [H, S, d_v]

    # Scores (contract last dims of both operands -> no explicit transpose),
    # additive mask bias, numerically stable softmax with approx EUP reciprocal.
    scores = jnp.einsum('hqe,hke->hqk', q_h, k_h,
                        preferred_element_type=jnp.float32)    # [H, S, S]
    scores = scores + bias_ref[...]                            # [1,S,S] bcast over H
    scores = scores - jnp.max(scores, axis=-1, keepdims=True)
    e = jnp.exp(scores)
    attn = e * pl.reciprocal(jnp.sum(e, axis=-1, keepdims=True), approx=True)

    # Context stays in vregs (no scratch round-trip).
    ctx = jnp.einsum('hqk,hke->hqe', attn, v_h,
                     preferred_element_type=jnp.float32)       # [H, S, d_v]

    # Output projection per head, head-sum over the leading dim only.
    proj = jnp.einsum('hse,hem->hsm', ctx, wo_ref[...],
                      preferred_element_type=jnp.float32)      # [H, S, D]
    small = small_ref[...]                                     # [3, D]
    out = proj.sum(axis=0) + small[0:1] + q_in                 # + b_O + residual

    # LayerNorm over the last dim (eps=1e-5, biased variance, affine).
    mean = jnp.mean(out, axis=-1, keepdims=True)
    var = jnp.mean((out - mean) ** 2, axis=-1, keepdims=True)
    normed = (out - mean) * jax.lax.rsqrt(var + LN_EPS)
    out_ref[0] = (normed * small[1:2] + small[2:3]).astype(out_ref.dtype)


def pack_params(params):
    """One-time, host-side parameter packing (call once; not in the per-call path)."""
    assert D_K == D_V, "fused QKV slab assumes d_k == d_v"
    H, dk, dv, D = N_HEADS, D_K, D_V, D_MODEL
    scale = np.float32(1.0 / np.sqrt(dk))

    def per_head_w(w, cols):   # [D, H*cols] -> [H, D, cols]
        return w.reshape(D, H, cols).transpose(1, 0, 2)

    def per_head_b(b, cols):   # [1, H*cols] -> [H, 1, cols]
        return b.reshape(H, 1, cols)

    wqkv = jnp.concatenate([per_head_w(params["W_Q"] * scale, dk),
                            per_head_w(params["W_K"], dk),
                            per_head_w(params["W_V"], dv)], axis=0)     # [3H, D, dk]
    bqkv = jnp.concatenate([per_head_b(params["b_Q"] * scale, dk),
                            per_head_b(params["b_K"], dk),
                            per_head_b(params["b_V"], dv)], axis=0)     # [3H, 1, dk]
    wo = params["W_O"].reshape(H, dv, D)                                # [H, dv, D]
    small = jnp.concatenate([params["b_O"], params["gamma"], params["beta"]],
                            axis=0)                                     # [3, D]
    return {"wqkv": wqkv, "bqkv": bqkv, "wo": wo, "small": small}


def multi_head_attention(Q, K, V, attn_mask, packed):
    """Q, K, V: [B, S, d_model] f32; attn_mask: [B, S_q, S_k] bool (True == masked)."""
    B, S, D = Q.shape
    H, dk, dv = N_HEADS, D_K, D_V

    xqkv = jnp.stack([Q, K, V], axis=1)                                  # [B, 3, S, D]
    mask_bias = jnp.where(attn_mask, -1e9, 0.0).astype(jnp.float32)      # [B, S, S]

    return pl.pallas_call(
        mha_kernel,
        out_shape=jax.ShapeDtypeStruct((B, S, D), jnp.float32),
        grid=(B,),
        in_specs=[
            pl.BlockSpec((1, 3, S, D), lambda b: (b, 0, 0, 0)),          # per-batch QKV
            pl.BlockSpec((1, S, S), lambda b: (b, 0, 0)),                # per-batch mask bias
            pl.BlockSpec((3 * H, D, dk), lambda b: (0, 0, 0)),           # shared weights
            pl.BlockSpec((3 * H, 1, dk), lambda b: (0, 0, 0)),
            pl.BlockSpec((H, dv, D), lambda b: (0, 0, 0)),
            pl.BlockSpec((3, D), lambda b: (0, 0)),
        ],
        out_specs=pl.BlockSpec((1, S, D), lambda b: (b, 0, 0)),
        compiler_params=pltpu.CompilerParams(dimension_semantics=("parallel",)),
    )(xqkv, mask_bias, packed["wqkv"], packed["bqkv"], packed["wo"], packed["small"])


def reference_mha(Q, K, V, attn_mask, params):
    """Pure-JAX reference mirroring the PyTorch module semantics."""
    B, S, D = Q.shape
    q_s = (Q @ params["W_Q"] + params["b_Q"]).reshape(B, S, N_HEADS, D_K).transpose(0, 2, 1, 3)
    k_s = (K @ params["W_K"] + params["b_K"]).reshape(B, S, N_HEADS, D_K).transpose(0, 2, 1, 3)
    v_s = (V @ params["W_V"] + params["b_V"]).reshape(B, S, N_HEADS, D_V).transpose(0, 2, 1, 3)
    scores = jnp.einsum("bhqd,bhkd->bhqk", q_s, k_s) / np.sqrt(D_K)
    scores = jnp.where(attn_mask[:, None, :, :], -1e9, scores)
    attn = jax.nn.softmax(scores, axis=-1)
    ctx = jnp.einsum("bhqk,bhkd->bhqd", attn, v_s)
    ctx = ctx.transpose(0, 2, 1, 3).reshape(B, S, N_HEADS * D_V)
    out = ctx @ params["W_O"] + params["b_O"] + Q
    mean = jnp.mean(out, axis=-1, keepdims=True)
    var = jnp.mean((out - mean) ** 2, axis=-1, keepdims=True)
    normed = (out - mean) / jnp.sqrt(var + LN_EPS)
    return normed * params["gamma"] + params["beta"]


def init_params(key):
    ks = jax.random.split(key, 8)
    scale = 0.05
    # nn.Linear(d_model, n_heads*d_k) etc., stored transposed (in, out) so the
    # math is x @ W + b (same linear map as the PyTorch module).
    return {
        "W_Q": jax.random.normal(ks[0], (D_MODEL, N_HEADS * D_K), jnp.float32) * scale,
        "b_Q": jax.random.normal(ks[1], (1, N_HEADS * D_K), jnp.float32) * scale,
        "W_K": jax.random.normal(ks[2], (D_MODEL, N_HEADS * D_K), jnp.float32) * scale,
        "b_K": jax.random.normal(ks[3], (1, N_HEADS * D_K), jnp.float32) * scale,
        "W_V": jax.random.normal(ks[4], (D_MODEL, N_HEADS * D_V), jnp.float32) * scale,
        "b_V": jax.random.normal(ks[5], (1, N_HEADS * D_V), jnp.float32) * scale,
        "W_O": jax.random.normal(ks[6], (N_HEADS * D_V, D_MODEL), jnp.float32) * scale,
        "b_O": jax.random.normal(ks[7], (1, D_MODEL), jnp.float32) * scale,
        "gamma": jnp.ones((1, D_MODEL), jnp.float32),
        "beta": jnp.zeros((1, D_MODEL), jnp.float32),
    }


if __name__ == "__main__":
    key = jax.random.PRNGKey(0)
    kq, kk, kv, kp = jax.random.split(key, 4)

    Q = jax.random.normal(kq, (BATCH, SEQ, D_MODEL), jnp.float32)
    K = jax.random.normal(kk, (BATCH, SEQ, D_MODEL), jnp.float32)
    V = jax.random.normal(kv, (BATCH, SEQ, D_MODEL), jnp.float32)

    # deterministic key-padding-style mask: last 2 key positions of batch 1 masked
    key_pad = jnp.zeros((BATCH, SEQ), dtype=bool).at[1, SEQ - 2:].set(True)
    attn_mask = jnp.broadcast_to(key_pad[:, None, :], (BATCH, SEQ, SEQ))

    params = init_params(kp)
    packed = pack_params(params)          # one-time packing, outside per-call path

    out = multi_head_attention(Q, K, V, attn_mask, packed)
    out = jax.block_until_ready(out)

    ref = reference_mha(Q, K, V, attn_mask, params)
    # atol headroom accounts for the approx=True EUP reciprocal in the softmax
    # (denominator >= 1, expected error well below this; see perf review note).
    np.testing.assert_allclose(np.asarray(out), np.asarray(ref), rtol=1e-4, atol=5e-4)

    print("KERNEL_OK")
</pallas_src>

<mosaic_0001>
module attributes {stable_mosaic.version = 11 : i64} {
  func.func @mha_kernel(%arg0: i32, %arg1: memref<1x3x8x32xf32, #tpu.memory_space<vmem>>, %arg2: memref<1x8x8xf32, #tpu.memory_space<vmem>>, %arg3: memref<12x32x8xf32, #tpu.memory_space<vmem>>, %arg4: memref<12x1x8xf32, #tpu.memory_space<vmem>>, %arg5: memref<4x8x32xf32, #tpu.memory_space<vmem>>, %arg6: memref<3x32xf32, #tpu.memory_space<vmem>>, %arg7: memref<1x8x32xf32, #tpu.memory_space<vmem>>) attributes {dimension_semantics = [#tpu.dimension_semantics<parallel>], iteration_bounds = array<i64: 2>, scalar_prefetch = 0 : i64, scratch_operands = 0 : i64, tpu.core_type = #tpu.core_type<tc>, window_params = [{transform_indices = @transform_0, window_bounds = array<i64: 1, 3, 8, 32>}, {transform_indices = @transform_1, window_bounds = array<i64: 1, 8, 8>}, {pipeline_mode = #tpu.pipeline_mode<synchronous>, transform_indices = @transform_2, window_bounds = array<i64: 12, 32, 8>}, {pipeline_mode = #tpu.pipeline_mode<synchronous>, transform_indices = @transform_3, window_bounds = array<i64: 12, 1, 8>}, {pipeline_mode = #tpu.pipeline_mode<synchronous>, transform_indices = @transform_4, window_bounds = array<i64: 4, 8, 32>}, {pipeline_mode = #tpu.pipeline_mode<synchronous>, transform_indices = @transform_5, window_bounds = array<i64: 3, 32>}, {transform_indices = @transform_6, window_bounds = array<i64: 1, 8, 32>}]} {
    %c0 = arith.constant 0 : index
    %c0_0 = arith.constant 0 : index
    %c0_1 = arith.constant 0 : index
    %c0_2 = arith.constant 0 : index
    %0 = vector.load %arg1[%c0, %c0_0, %c0_1, %c0_2] : memref<1x3x8x32xf32, #tpu.memory_space<vmem>>, vector<1x3x8x32xf32>
    %1 = vector.shape_cast %0 : vector<1x3x8x32xf32> to vector<3x8x32xf32>
    %2 = vector.extract_strided_slice %1 {offsets = [0, 0, 0], sizes = [1, 8, 32], strides = [1, 1, 1]} : vector<3x8x32xf32> to vector<1x8x32xf32>
    %3 = vector.shape_cast %2 : vector<1x8x32xf32> to vector<8x32xf32>
    %4 = vector.shape_cast %1 : vector<3x8x32xf32> to vector<3x1x8x32xf32>
    %5 = vector.shape_cast %4 : vector<3x1x8x32xf32> to vector<3x1x8x32xf32>
    %6 = vector.broadcast %5 : vector<3x1x8x32xf32> to vector<3x4x8x32xf32>
    %7 = vector.shape_cast %6 : vector<3x4x8x32xf32> to vector<12x8x32xf32>
    %c0_3 = arith.constant 0 : index
    %c0_4 = arith.constant 0 : index
    %c0_5 = arith.constant 0 : index
    %8 = vector.load %arg3[%c0_3, %c0_4, %c0_5] : memref<12x32x8xf32, #tpu.memory_space<vmem>>, vector<12x32x8xf32>
    "tpu.trace_start"() <{level = 10 : i32, message = "nsd,nde->nse"}> : () -> ()
    %cst = arith.constant dense<0.000000e+00> : vector<12x8x8xf32>
    %9 = tpu.matmul %7, %8, %cst {dimension_numbers = #tpu.dot_dimension_numbers<[2], [1], [1], [2], [0, 0, 0, 1, 1, 2], [0], [0]>} : vector<12x8x32xf32>, vector<12x32x8xf32>, vector<12x8x8xf32> -> vector<12x8x8xf32>
    "tpu.trace_stop"() : () -> ()
    %c0_6 = arith.constant 0 : index
    %c0_7 = arith.constant 0 : index
    %c0_8 = arith.constant 0 : index
    %10 = vector.load %arg4[%c0_6, %c0_7, %c0_8] : memref<12x1x8xf32, #tpu.memory_space<vmem>>, vector<12x1x8xf32>
    %11 = vector.broadcast %10 : vector<12x1x8xf32> to vector<12x8x8xf32>
    %12 = arith.addf %9, %11 : vector<12x8x8xf32>
    %13 = vector.extract_strided_slice %12 {offsets = [0, 0, 0], sizes = [4, 8, 8], strides = [1, 1, 1]} : vector<12x8x8xf32> to vector<4x8x8xf32>
    %14 = vector.extract_strided_slice %12 {offsets = [4, 0, 0], sizes = [4, 8, 8], strides = [1, 1, 1]} : vector<12x8x8xf32> to vector<4x8x8xf32>
    %15 = vector.extract_strided_slice %12 {offsets = [8, 0, 0], sizes = [4, 8, 8], strides = [1, 1, 1]} : vector<12x8x8xf32> to vector<4x8x8xf32>
    "tpu.trace_start"() <{level = 10 : i32, message = "hqe,hke->hqk"}> : () -> ()
    %cst_9 = arith.constant dense<0.000000e+00> : vector<4x8x8xf32>
    %16 = tpu.matmul %13, %14, %cst_9 {dimension_numbers = #tpu.dot_dimension_numbers<[2], [2], [1], [1], [0, 0, 0, 1, 1, 1], [0], [0]>} : vector<4x8x8xf32>, vector<4x8x8xf32>, vector<4x8x8xf32> -> vector<4x8x8xf32>
    "tpu.trace_stop"() : () -> ()
    %c0_10 = arith.constant 0 : index
    %c0_11 = arith.constant 0 : index
    %c0_12 = arith.constant 0 : index
    %17 = vector.load %arg2[%c0_10, %c0_11, %c0_12] : memref<1x8x8xf32, #tpu.memory_space<vmem>>, vector<1x8x8xf32>
    %18 = vector.broadcast %17 : vector<1x8x8xf32> to vector<4x8x8xf32>
    %19 = arith.addf %16, %18 : vector<4x8x8xf32>
    %cst_13 = arith.constant dense<0xFF800000> : vector<4x8xf32>
    %20 = vector.multi_reduction <maximumf>, %19, %cst_13 [2] : vector<4x8x8xf32> to vector<4x8xf32>
    %21 = vector.shape_cast %20 : vector<4x8xf32> to vector<4x8x1xf32>
    %22 = vector.broadcast %21 : vector<4x8x1xf32> to vector<4x8x8xf32>
    %23 = arith.subf %19, %22 : vector<4x8x8xf32>
    %24 = math.exp %23 : vector<4x8x8xf32>
    %cst_14 = arith.constant dense<0.000000e+00> : vector<4x8xf32>
    %25 = vector.multi_reduction <add>, %24, %cst_14 [2] : vector<4x8x8xf32> to vector<4x8xf32>
    %26 = vector.shape_cast %25 : vector<4x8xf32> to vector<4x8x1xf32>
    %27 = tpu.reciprocal %26 {approx = true} : vector<4x8x1xf32> -> vector<4x8x1xf32>
    %28 = vector.broadcast %27 : vector<4x8x1xf32> to vector<4x8x8xf32>
    %29 = arith.mulf %24, %28 : vector<4x8x8xf32>
    "tpu.trace_start"() <{level = 10 : i32, message = "hqk,hke->hqe"}> : () -> ()
    %cst_15 = arith.constant dense<0.000000e+00> : vector<4x8x8xf32>
    %30 = tpu.matmul %29, %15, %cst_15 {dimension_numbers = #tpu.dot_dimension_numbers<[2], [1], [1], [2], [0, 0, 0, 1, 1, 2], [0], [0]>} : vector<4x8x8xf32>, vector<4x8x8xf32>, vector<4x8x8xf32> -> vector<4x8x8xf32>
    "tpu.trace_stop"() : () -> ()
    %c0_16 = arith.constant 0 : index
    %c0_17 = arith.constant 0 : index
    %c0_18 = arith.constant 0 : index
    %31 = vector.load %arg5[%c0_16, %c0_17, %c0_18] : memref<4x8x32xf32, #tpu.memory_space<vmem>>, vector<4x8x32xf32>
    "tpu.trace_start"() <{level = 10 : i32, message = "hse,hem->hsm"}> : () -> ()
    %cst_19 = arith.constant dense<0.000000e+00> : vector<4x8x32xf32>
    %32 = tpu.matmul %30, %31, %cst_19 {dimension_numbers = #tpu.dot_dimension_numbers<[2], [1], [1], [2], [0, 0, 0, 1, 1, 2], [0], [0]>} : vector<4x8x8xf32>, vector<4x8x32xf32>, vector<4x8x32xf32> -> vector<4x8x32xf32>
    "tpu.trace_stop"() : () -> ()
    %c0_20 = arith.constant 0 : index
    %c0_21 = arith.constant 0 : index
    %33 = vector.load %arg6[%c0_20, %c0_21] : memref<3x32xf32, #tpu.memory_space<vmem>>, vector<3x32xf32>
    %cst_22 = arith.constant dense<0.000000e+00> : vector<8x32xf32>
    %34 = vector.multi_reduction <add>, %32, %cst_22 [0] : vector<4x8x32xf32> to vector<8x32xf32>
    %35 = vector.extract_strided_slice %33 {offsets = [0, 0], sizes = [1, 32], strides = [1, 1]} : vector<3x32xf32> to vector<1x32xf32>
    %36 = vector.broadcast %35 : vector<1x32xf32> to vector<8x32xf32>
    %37 = arith.addf %34, %36 : vector<8x32xf32>
    %38 = arith.addf %37, %3 : vector<8x32xf32>
    %cst_23 = arith.constant dense<0.000000e+00> : vector<8xf32>
    %39 = vector.multi_reduction <add>, %38, %cst_23 [1] : vector<8x32xf32> to vector<8xf32>
    %40 = vector.shape_cast %39 : vector<8xf32> to vector<8x1xf32>
    %cst_24 = arith.constant 3.200000e+01 : f32
    %41 = vector.broadcast %cst_24 : f32 to vector<8x1xf32>
    %42 = arith.divf %40, %41 : vector<8x1xf32>
    %43 = vector.broadcast %42 : vector<8x1xf32> to vector<8x32xf32>
    %44 = arith.subf %38, %43 : vector<8x32xf32>
    %45 = arith.mulf %44, %44 : vector<8x32xf32>
    %cst_25 = arith.constant dense<0.000000e+00> : vector<8xf32>
    %46 = vector.multi_reduction <add>, %45, %cst_25 [1] : vector<8x32xf32> to vector<8xf32>
    %47 = vector.shape_cast %46 : vector<8xf32> to vector<8x1xf32>
    %cst_26 = arith.constant 3.200000e+01 : f32
    %48 = vector.broadcast %cst_26 : f32 to vector<8x1xf32>
    %49 = arith.divf %47, %48 : vector<8x1xf32>
    %50 = vector.broadcast %42 : vector<8x1xf32> to vector<8x32xf32>
    %51 = arith.subf %38, %50 : vector<8x32xf32>
    %cst_27 = arith.constant 9.99999974E-6 : f32
    %52 = vector.broadcast %cst_27 : f32 to vector<8x1xf32>
    %53 = arith.addf %49, %52 : vector<8x1xf32>
    %54 = math.rsqrt %53 : vector<8x1xf32>
    %55 = vector.broadcast %54 : vector<8x1xf32> to vector<8x32xf32>
    %56 = arith.mulf %51, %55 : vector<8x32xf32>
    %57 = vector.extract_strided_slice %33 {offsets = [1, 0], sizes = [1, 32], strides = [1, 1]} : vector<3x32xf32> to vector<1x32xf32>
    %58 = vector.broadcast %57 : vector<1x32xf32> to vector<8x32xf32>
    %59 = arith.mulf %56, %58 : vector<8x32xf32>
    %60 = vector.extract_strided_slice %33 {offsets = [2, 0], sizes = [1, 32], strides = [1, 1]} : vector<3x32xf32> to vector<1x32xf32>
    %61 = vector.broadcast %60 : vector<1x32xf32> to vector<8x32xf32>
    %62 = arith.addf %59, %61 : vector<8x32xf32>
    %c0_28 = arith.constant 0 : index
    %c0_29 = arith.constant 0 : index
    %c0_30 = arith.constant 0 : index
    %63 = vector.load %arg7[%c0_28, %c0_29, %c0_30] : memref<1x8x32xf32, #tpu.memory_space<vmem>>, vector<1x8x32xf32>
    %64 = vector.shape_cast %63 : vector<1x8x32xf32> to vector<8x32xf32>
    %65 = vector.shape_cast %62 : vector<8x32xf32> to vector<1x8x32xf32>
    tpu.vector_store %arg7[%c0_28, %c0_29, %c0_30], %65 {strides = array<i32>} : memref<1x8x32xf32, #tpu.memory_space<vmem>>, vector<1x8x32xf32>,
    return
  }
  func.func @transform_0(%arg0: i32) -> (i32, i32, i32, i32) {
    %c0_i32 = arith.constant 0 : i32
    %c0_i32_0 = arith.constant 0 : i32
    %c0_i32_1 = arith.constant 0 : i32
    %c0_i32_2 = arith.constant 0 : i32
    return %arg0, %c0_i32, %c0_i32_0, %c0_i32_1 : i32, i32, i32, i32
  }
  func.func @transform_1(%arg0: i32) -> (i32, i32, i32) {
    %c0_i32 = arith.constant 0 : i32
    %c0_i32_0 = arith.constant 0 : i32
    %c0_i32_1 = arith.constant 0 : i32
    return %arg0, %c0_i32, %c0_i32_0 : i32, i32, i32
  }
  func.func @transform_2(%arg0: i32) -> (i32, i32, i32) {
    %c0_i32 = arith.constant 0 : i32
    %c0_i32_0 = arith.constant 0 : i32
    %c0_i32_1 = arith.constant 0 : i32
    %c0_i32_2 = arith.constant 0 : i32
    return %c0_i32, %c0_i32_0, %c0_i32_1 : i32, i32, i32
  }
  func.func @transform_3(%arg0: i32) -> (i32, i32, i32) {
    %c0_i32 = arith.constant 0 : i32
    %c0_i32_0 = arith.constant 0 : i32
    %c0_i32_1 = arith.constant 0 : i32
    %c0_i32_2 = arith.constant 0 : i32
    return %c0_i32, %c0_i32_0, %c0_i32_1 : i32, i32, i32
  }
  func.func @transform_4(%arg0: i32) -> (i32, i32, i32) {
    %c0_i32 = arith.constant 0 : i32
    %c0_i32_0 = arith.constant 0 : i32
    %c0_i32_1 = arith.constant 0 : i32
    %c0_i32_2 = arith.constant 0 : i32
    return %c0_i32, %c0_i32_0, %c0_i32_1 : i32, i32, i32
  }
  func.func @transform_5(%arg0: i32) -> (i32, i32) {
    %c0_i32 = arith.constant 0 : i32
    %c0_i32_0 = arith.constant 0 : i32
    %c0_i32_1 = arith.constant 0 : i32
    return %c0_i32, %c0_i32_0 : i32, i32
  }
  func.func @transform_6(%arg0: i32) -> (i32, i32, i32) {
    %c0_i32 = arith.constant 0 : i32
    %c0_i32_0 = arith.constant 0 : i32
    %c0_i32_1 = arith.constant 0 : i32
    return %arg0, %c0_i32, %c0_i32_0 : i32, i32, i32
  }
}

</mosaic_0001>

<bundles_post_ra>
// kernel: tpu_custom_call.1
= control target key start
LH: loop header
LB: loop body
LE: loop exit
PB: predicated region body
PF: predicated region fallthrough
CT: control target
= control target key end

     0   :  { %11 = vsyncpa [#allocation3], 0  ;;  %s1640_s0 = inlined_call_operand.vmem [shape: f32[2,3,8,32], index: 0, kind: input, shape index: {}]   ;;  %s1641_s1 = inlined_call_operand.vmem [shape: f32[2,8,8], index: 1, kind: input, shape index: {}]   ;;  %s1642_s2 = inlined_call_operand.vmem [shape: f32[12,32,8], index: 2, kind: input, shape index: {}]   ;;  %s1643_s3 = inlined_call_operand.vmem [shape: f32[12,1,8], index: 3, kind: input, shape index: {}]   ;;  %s1644_s4 = inlined_call_operand.vmem [shape: f32[4,8,32], index: 4, kind: input, shape index: {}]   ;;  %s1645_s5 = inlined_call_operand.vmem [shape: f32[3,32], index: 5, kind: input, shape index: {}]   ;;  %s1646_s6 = inlined_call_operand.hbm [shape: f32[2,8,32], index: 6, kind: output, shape index: {}]  }
   0x1   :  { %13 = vsyncpa [#allocation3 + $0x1], 0  ;;  %s1298_s21 = smov 0   ;;  %s1300_s22 = smov 0  }
   0x2   :  { %s1302_s23 = smov 0   ;;  %s1304_s24 = smov 0  }
   0x3 LB: > { %s1319_s25 = sadd.s32 4294967295, %s1260_s24   ;;  %s1086_s26 = sadd.s32 4294967294, %s1260_s24   ;;  %s1260_s24 = sphi %s1304_s24, %s1652_s24   ;;  %s1256_s23 = sphi %s1302_s23, %s1651_s23   ;;  %s1252_s22 = sphi %s1300_s22, %s1650_s22   ;;  %s1248_s21 = sphi %s1298_s21, %s1649_s21  }
   0x4   : > { %s1323_s27 = sadd.s32 1, %s1260_s24   ;;  %s162_s28 = sadd.s32 1, %s1256_s23 }
   0x5   : > { %s159_s29 = ssub.s32 %s1260_s24, %s1323_s27  ;;  %p172_p0 = scmp.ne.s32.totalorder %s1256_s23, %s1252_s22 }
   0x6   : > { %p160_p1 = scmp.eq.s32.totalorder %s159_s29, 0  ;;  %p173_p2 = scmp.eq.s32.totalorder %s1319_s25, 1 }
   0x7   : > { %p178_p3 = scmp.ne.s32.totalorder %s1252_s22, %s1248_s21  ;;  %p179_p4 = scmp.eq.s32.totalorder %s1086_s26, 1 }
   0x8   : > { %s1334_s30 = scalar_select %p160_p1, %s1256_s23, %s162_s28  }
   0x9   : > { %p1336_p5 = por %p173_p2, %p172_p0  ;;  %p1340_p6 = por %p179_p4, %p178_p3 }
   0xa   : > { %p1089_p7 = scmp.ge.s32.totalorder %s1260_s24, 1  ;;  %p224_p8 = scmp.lt.s32.totalorder %s1260_s24, 3 }
   0xc   : > { %p225_p9 = pnand %p1089_p7, %p224_p8 }
   0xd   : > { %p258_p10 = scmp.lt.s32.totalorder (!%p225_p9), %s1319_s25, 1  ;;  %s255_s29 = sand.u32 (!%p225_p9), 1, %s1252_s22  }
   0xe   : > { %228 = sbr.rel (%p225_p9) target bundleno = 1112 (0x458), region = 44  ;;  %s1122_s12 = sshll.u32 (!%p225_p9), %s1319_s25, 3 }
   0xf   : > { %s1218_s26 = scalar_lea.hbm (!%p225_p9), %s1646_s6, 16 }
  0x13   : > { %v273_v0 = vld [vmem:[%s1642_s2 + $0x18] sm:$0xff]  ;;  %v272_v3 = vld [vmem:[%s1642_s2 + $0x10] sm:$0xff]  ;;  %v271_v6 = vld [vmem:[%s1642_s2 + $0x8] sm:$0xff]  ;;  %s1372_s10 = scalar_select %p258_p10, %s1319_s25, 1  ;;  %vm366_vm0 = vcmask 261120   ;;  %vm617_vm1 = vcmask 64512  }
  0x14   : > { %v281_v1 = vld [vmem:[%s1642_s2 + $0x58] sm:$0xff]  ;;  %382 = vmatpush.msra.mxu0 %v273_v0  ;;  %v280_v4 = vld [vmem:[%s1642_s2 + $0x50] sm:$0xff]  ;;  %v279_v7 = vld [vmem:[%s1642_s2 + $0x48] sm:$0xff]  ;;  %s1000_s25 = scalar_lea.sflag [#allocation3], %s255_s29 }
  0x15   : > { %v285_v2 = vld [vmem:[%s1642_s2 + $0x78] sm:$0xff]  ;;  %422 = vmatpush.msra.mxu2 %v281_v1  ;;  %v284_v5 = vld [vmem:[%s1642_s2 + $0x70] sm:$0xff]  ;;  %v283_v8 = vld [vmem:[%s1642_s2 + $0x68] sm:$0xff]  ;;  %s1125_s17 = smul.u32 24, %s1372_s10  ;;  %s1092_s11 = sshll.u32 %s1372_s10, 3 }
  0x16   : > { %442 = vmatpush.msra.mxu3 %v285_v2  ;;  %383 = vmatpush.msra.mxu0 %v272_v3  ;;  %v270_v9 = vld [vmem:[%s1642_s2] sm:$0xff]  ;;  %v277_v11 = vld [vmem:[%s1642_s2 + $0x38] sm:$0xff]  ;;  %v276_v17 = vld [vmem:[%s1642_s2 + $0x30] sm:$0xff]  ;;  %s266_s14 = scalar_lea.vmem %s1641_s1, %s1092_s11  ;;  %s1090_s11 = sshll.u32 %s255_s29, 3 }
  0x17   : > { %423 = vmatpush.msra.mxu2 %v280_v4  ;;  %v278_v10 = vld [vmem:[%s1642_s2 + $0x40] sm:$0xff]  ;;  %s1393_s9 = scalar_lea.vmem %s1640_s0, %s1125_s17  ;;  %402 = vmatpush.msra.mxu1 %v277_v11  ;;  %v289_v13 = vld [vmem:[%s1642_s2 + $0x98] sm:$0xff]  ;;  %v288_v18 = vld [vmem:[%s1642_s2 + $0x90] sm:$0xff]  ;;  %s1010_s10 = scalar_lea.hbm %s1646_s6, %s1122_s12 }
  0x18   : > { %443 = vmatpush.msra.mxu3 %v284_v5  ;;  %384 = vmatpush.msra.mxu0 %v271_v6  ;;  %v282_v12 = vld [vmem:[%s1642_s2 + $0x60] sm:$0xff]  ;;  %v297_v15 = vld [vmem:[%s1642_s2 + $0xd8] sm:$0xff]  ;;  %v296_v19 = vld [vmem:[%s1642_s2 + $0xd0] sm:$0xff]  ;;  %s257_s15 = scalar_lea.vmem [#allocation2], %s1090_s11 }
  0x19   : > { %424 = vmatpush.msra.mxu2 %v279_v7  ;;  %v1399_v14 = vld [vmem:[%s1393_s9] sm:$0xff]  ;;  %v301_v16 = vld [vmem:[%s1642_s2 + $0xf8] sm:$0xff]  ;;  %v300_v20 = vld [vmem:[%s1642_s2 + $0xf0] sm:$0xff]  ;;  %403 = vmatpush.msra.mxu1 %v276_v17  ;;  %s1012_s16 = sshll.u32 %s257_s15, 4  ;;  %s1013_s16 = int_to_ptr.vmem [resolvable:$true] %s1012_s16 }
  0x1a   : > { %444 = vmatpush.msra.mxu3 %v283_v8  ;;  %385 = vmatpush.msra.mxu0 %v270_v9  ;;  %v275_v21 = vld [vmem:[%s1642_s2 + $0x28] sm:$0xff]  ;;  %v274_v25 = vld [vmem:[%s1642_s2 + $0x20] sm:$0xff]  ;;  %v293_v30 = vld [vmem:[%s1642_s2 + $0xb8] sm:$0xff] }
  0x1b   : > { %425 = vmatpush.msra.mxu2 %v278_v10  ;;  %1093 = vmatmul.msk.f32.vlgmr.msra.gmra.mxu0 %vm366_vm0, %v1399_v14  ;;  %v287_v22 = vld [vmem:[%s1642_s2 + $0x88] sm:$0xff]  ;;  %v286_v26 = vld [vmem:[%s1642_s2 + $0x80] sm:$0xff]  ;;  %v305_v31 = vld [vmem:[%s1642_s2 + $0x118] sm:$0xff] }
  0x1c   : > { %445 = vmatpush.msra.mxu3 %v282_v12  ;;  %1095 = vmatmul.msk.f32.vlgmr.msra.gmra.mxu2 %vm366_vm0, %v1399_v14  ;;  %v295_v23 = vld [vmem:[%s1642_s2 + $0xc8] sm:$0xff]  ;;  %v294_v27 = vld [vmem:[%s1642_s2 + $0xc0] sm:$0xff]  ;;  %v292_v32 = vld [vmem:[%s1642_s2 + $0xb0] sm:$0xff] }
  0x1d   : > { %1096 = vmatmul.msk.f32.vlgmr.msra.gmra.mxu3 %vm366_vm0, %v1399_v14  ;;  %465 = vmatpush.msrb.mxu0 %v289_v13  ;;  %v299_v24 = vld [vmem:[%s1642_s2 + $0xe8] sm:$0xff]  ;;  %v298_v28 = vld [vmem:[%s1642_s2 + $0xe0] sm:$0xff]  ;;  %v304_v35 = vld [vmem:[%s1642_s2 + $0x110] sm:$0xff] }
  0x1e   : > { %505 = vmatpush.msrb.mxu2 %v297_v15  ;;  %525 = vmatpush.msrb.mxu3 %v301_v16  ;;  %v268_v29 = vld [vmem:[%s1393_s9 + $0x8] sm:$0xff]  ;;  %v290_v34 = vld [vmem:[%s1642_s2 + $0xa0] sm:$0xff]  ;;  %v313_v37 = vld [vmem:[%s1642_s2 + $0x158] sm:$0xff] }
  0x1f   : > { %466 = vmatpush.msrb.mxu0 %v288_v18  ;;  %404 = vmatpush.msra.mxu1 %v275_v21  ;;  %v291_v33 = vld [vmem:[%s1642_s2 + $0xa8] sm:$0xff]  ;;  %v317_v38 = vld [vmem:[%s1642_s2 + $0x178] sm:$0xff]  ;;  %v302_v39 = vld [vmem:[%s1642_s2 + $0x100] sm:$0xff] }
  0x20   : > { %506 = vmatpush.msrb.mxu2 %v296_v19  ;;  %526 = vmatpush.msrb.mxu3 %v300_v20  ;;  %v303_v36 = vld [vmem:[%s1642_s2 + $0x108] sm:$0xff]  ;;  %v269_v40 = vld [vmem:[%s1393_s9 + $0x10] sm:$0xff]  ;;  %v309_v41 = vld [vmem:[%s1642_s2 + $0x138] sm:$0xff]  ;;  %s1014_s9 = sshll.u32 %s1010_s10, 4  ;;  %s1015_s9 = int_to_ptr.hbm [resolvable:$true] %s1014_s9 }
  0x21   : > { %467 = vmatpush.msrb.mxu0 %v287_v22  ;;  %405 = vmatpush.msra.mxu1 %v274_v25  ;;  %v312_v42 = vld [vmem:[%s1642_s2 + $0x150] sm:$0xff]  ;;  %v311_v45 = vld [vmem:[%s1642_s2 + $0x148] sm:$0xff]  ;;  %v310_v48 = vld [vmem:[%s1642_s2 + $0x140] sm:$0xff]  ;;  %s1212_s17 = sshra.s32 %s1015_s9, 4  ;;  %s1213_s17 = int_to_ptr.hbm [resolvable:$true] %s1212_s17 }
  0x22   : > { %507 = vmatpush.msrb.mxu2 %v295_v23  ;;  %527 = vmatpush.msrb.mxu3 %v299_v24  ;;  %v316_v43 = vld [vmem:[%s1642_s2 + $0x170] sm:$0xff]  ;;  %v315_v46 = vld [vmem:[%s1642_s2 + $0x168] sm:$0xff]  ;;  %v314_v49 = vld [vmem:[%s1642_s2 + $0x160] sm:$0xff]  ;;  %s1214_s18 = scalar_lea.hbm %s1213_s17, 8  ;;  %p1219_p0 = scmp.lt.s32.totalorder %s1213_s17, %s1646_s6 }
  0x23   : > { %468 = vmatpush.msrb.mxu0 %v286_v26  ;;  %1094 = vmatmul.msk.f32.vlgmr.msra.gmra.mxu1 %vm366_vm0, %v1399_v14  ;;  %v308_v44 = vld [vmem:[%s1642_s2 + $0x130] sm:$0xff]  ;;  %v307_v47 = vld [vmem:[%s1642_s2 + $0x128] sm:$0xff]  ;;  %v306_v50 = vld [vmem:[%s1642_s2 + $0x120] sm:$0xff]  ;;  %p1215_p11 = scmp.ne.s32.totalorder %s1213_s17, %s1214_s18  ;;  %p1220_p1 = scmp.lt.s32.totalorder %s1218_s26, %s1214_s18 }
  0x24   : > { %508 = vmatpush.msrb.mxu2 %v294_v27  ;;  %528 = vmatpush.msrb.mxu3 %v298_v28  ;;  %v1170_v54 = vld [vmem:[%s1643_s3 + $0x4] ss:$0 sm:$0xff]  ;;  %v1166_v55 = vld [vmem:[%s1643_s3] ss:$0 sm:$0xff]  ;;  %v1171_v60 = vld [vmem:[%s1643_s3 + $0x6] ss:$0 sm:$0xff] }
  0x25   : > { %1097 = vmatmul.msk.f32.vlgmr.msrb.gmra.mxu0 %vm366_vm0, %v268_v29  ;;  %1099 = vmatmul.msk.f32.vlgmr.msrb.gmra.mxu2 %vm366_vm0, %v268_v29  ;;  %v1172_v61 = vld [vmem:[%s1643_s3 + $0x7] ss:$0 sm:$0xff]  ;;  %v1173_v62 = vld [vmem:[%s1643_s3 + $0x5] ss:$0 sm:$0xff]  ;;  %v1167_v63 = vld [vmem:[%s1643_s3 + $0x2] ss:$0 sm:$0xff]  ;;  %p1216_p12 = pnand %p1215_p11, %p1336_p5  ;;  %p1221_p2 = por %p1220_p1, %p1219_p0 }
  0x26   : > { %1100 = vmatmul.msk.f32.vlgmr.msrb.gmra.mxu3 %vm366_vm0, %v268_v29  ;;  %485 = vmatpush.msrb.mxu1 %v293_v30  ;;  %v1169_v0 = vld [vmem:[%s1643_s3 + $0x1] ss:$0 sm:$0xff]  ;;  %v1168_v2 = vld [vmem:[%s1643_s3 + $0x3] ss:$0 sm:$0xff]  ;;  %v1174_v11 = vld [vmem:[%s1643_s3 + $0x8] ss:$0 sm:$0xff] }
  0x27   : > { %548 = vmatpush.msra.mxu0 %v305_v31  ;;  %588 = vmatpush.msra.mxu2 %v313_v37  ;;  %v1175_v15 = vld [vmem:[%s1643_s3 + $0x9] ss:$0 sm:$0xff]  ;;  %v1176_v18 = vld [vmem:[%s1643_s3 + $0xa] ss:$0 sm:$0xff]  ;;  %v1177_v19 = vld [vmem:[%s1643_s3 + $0xb] ss:$0 sm:$0xff]  ;;  %p1217_p13 = pneg %p1216_p12 }
  0x28   : > { %486 = vmatpush.msrb.mxu1 %v292_v32  ;;  %608 = vmatpush.msra.mxu3 %v317_v38  ;;  %v616_v24 = vld [vmem:[%s266_s14] sm:$0xff] }
  0x29   : > { %549 = vmatpush.msra.mxu0 %v304_v35  ;;  %589 = vmatpush.msra.mxu2 %v312_v42  ;;  %p1222_p3 = pnand %p1221_p2, %p1217_p13 }
  0x2a   : > { %487 = vmatpush.msrb.mxu1 %v291_v33  ;;  %609 = vmatpush.msra.mxu3 %v316_v43 }
  0x2b   : > { %550 = vmatpush.msra.mxu0 %v303_v36  ;;  %590 = vmatpush.msra.mxu2 %v311_v45 }
  0x2c   : > { %488 = vmatpush.msrb.mxu1 %v290_v34  ;;  %610 = vmatpush.msra.mxu3 %v315_v46 }
  0x2d   : > { %1098 = vmatmul.msk.f32.vlgmr.msrb.gmra.mxu1 %vm366_vm0, %v268_v29  ;;  %551 = vmatpush.msra.mxu0 %v302_v39 }
  0x2e   : > { %1101 = vmatmul.msk.f32.vlgmr.msra.gmra.mxu0 %vm366_vm0, %v269_v40  ;;  %568 = vmatpush.msra.mxu1 %v309_v41 }
  0x2f   : > { %591 = vmatpush.msra.mxu2 %v310_v48  ;;  %611 = vmatpush.msra.mxu3 %v314_v49 }
  0x30   : > { %569 = vmatpush.msra.mxu1 %v308_v44  ;;  %1103 = vmatmul.msk.f32.vlgmr.msra.gmra.mxu2 %vm366_vm0, %v269_v40 }
  0x31   : > { %1104 = vmatmul.msk.f32.vlgmr.msra.gmra.mxu3 %vm366_vm0, %v269_v40 }
  0x32   : > { %570 = vmatpush.msra.mxu1 %v307_v47 }
  0x34   : > { %571 = vmatpush.msra.mxu1 %v306_v50 }
  0x35   : > { %1102 = vmatmul.msk.f32.vlgmr.msra.gmra.mxu1 %vm366_vm0, %v269_v40 }
  0x98   : > { %v387_v51 = vpop.f32.mrf.mxu0 }
  0x99   : > { %v388_v59 = vadd.f32 %v1166_v55, %v387_v51 }
  0x9f   : > { %v427_v52 = vpop.f32.mrf.mxu2 }
  0xa0   : > { %v447_v53 = vpop.f32.mrf.mxu3  ;;  %v407_v56 = vpop.f32.mrf.mxu1  ;;  %v428_v8 = vadd.f32 %v1167_v63, %v427_v52 }
  0xa1   : > { %v408_v9 = vadd.f32 %v1169_v0, %v407_v56  ;;  %v448_v10 = vadd.f32 %v1168_v2, %v447_v53 }
  0xa2   : > { %v470_v57 = vpop.f32.mrf.mxu0 }
  0xa3   : > { %v471_v58 = vadd.f32 %v1170_v54, %v470_v57 }
  0xa5   : > { %1105 = vmatpush.xpose.msk.msrb.mxu0 %vm617_vm1, %v471_v58 }
  0xa8   : > { %v510_v1 = vpop.f32.mrf.mxu2  ;;  %1106 = vmatmul.msk.f32.vlgmr.msrb.gmra.mxu0 %vm617_vm1, %v388_v59 }
  0xa9   : > { %v511_v3 = vadd.f32 %v1171_v60, %v510_v1  ;;  %v530_v4 = vpop.f32.mrf.mxu3 }
  0xaa   : > { %v531_v5 = vadd.f32 %v1172_v61, %v530_v4  ;;  %v490_v6 = vpop.f32.mrf.mxu1 }
  0xab   : > { %v491_v7 = vadd.f32 %v1173_v62, %v490_v6  ;;  %1109 = vmatpush.xpose.msk.msrb.mxu2 %vm617_vm1, %v511_v3  ;;  %v553_v12 = vpop.f32.mrf.mxu0  ;;  %v859_v6 = vld [vmem:[%s1644_s4 + $0x8] sm:$0xff] }
  0xac   : > { %1111 = vmatpush.xpose.msk.msrb.mxu3 %vm617_vm1, %v531_v5  ;;  %v554_v13 = vadd.f32 %v1174_v11, %v553_v12  ;;  %v858_v5 = vld [vmem:[%s1644_s4] sm:$0xff] }
  0xad   : > { %1107 = vmatpush.xpose.msk.msrb.mxu1 %vm617_vm1, %v491_v7  ;;  %v860_v7 = vld [vmem:[%s1644_s4 + $0x10] sm:$0xff] }
  0xae   : > { %1110 = vmatmul.msk.f32.vlgmr.msrb.gmra.mxu2 %vm617_vm1, %v428_v8  ;;  %784 = vmatpush.msra.mxu0 %v554_v13  ;;  %v861_v8 = vld [vmem:[%s1644_s4 + $0x18] sm:$0xff] }
  0xaf   : > { %1112 = vmatmul.msk.f32.vlgmr.msrb.gmra.mxu3 %vm617_vm1, %v448_v10 }
  0xb0   : > { %1108 = vmatmul.msk.f32.vlgmr.msrb.gmra.mxu1 %vm617_vm1, %v408_v9  ;;  %880 = vmatpush.msrb.mxu0 %v858_v5 }
  0xb2   : > { %v573_v16 = vpop.f32.mrf.mxu1 }
  0xb3   : > { %v574_v17 = vadd.f32 %v1175_v15, %v573_v16  ;;  %v593_v20 = vpop.f32.mrf.mxu2 }
  0xb4   : > { %v594_v21 = vadd.f32 %v1176_v18, %v593_v20  ;;  %v613_v22 = vpop.f32.mrf.mxu3  ;;  %v954_v20 = vld [vmem:[%s1645_s5] sm:$0x7] }
  0xb5   : > { %807 = vmatpush.msra.mxu1 %v574_v17  ;;  %v614_v23 = vadd.f32 %v1177_v19, %v613_v22 }
  0xb6   : > { %830 = vmatpush.msra.mxu2 %v594_v21 }
  0xb7   : > { %853 = vmatpush.msra.mxu3 %v614_v23  ;;  %903 = vmatpush.msrb.mxu1 %v859_v6 }
  0xb8   : > { %926 = vmatpush.msrb.mxu2 %v860_v7 }
  0xb9   : > { %949 = vmatpush.msrb.mxu3 %v861_v8 }
 0x125   : > { %v641_v25 = vpop.f32.mrf.mxu0 }
 0x126   : > { %v642_v26 = vadd.f32 %v641_v25, %v616_v24 }
 0x128   : > { %v722_v27 = vsel %vm617_vm1, %v642_v26, -inf }
 0x129   : > { %723 = vmax.xlane.f32.xlu1 %v722_v27 }
 0x12d   : > { %v667_v28 = vpop.f32.mrf.mxu1 }
 0x12e   : > { %v668_v29 = vadd.f32 %v667_v28, %v616_v24 }
 0x130   : > { %v725_v30 = vsel %vm617_vm1, %v668_v29, -inf }
 0x131   : > { %v693_v31 = vpop.f32.mrf.mxu2  ;;  %726 = vmax.xlane.f32.xlu1 %v725_v30  ;;  %v1262_v30 = vmov 32.0  }
 0x132   : > { %v694_v32 = vadd.f32 %v693_v31, %v616_v24  ;;  %v719_v34 = vpop.f32.mrf.mxu3 }
 0x133   : > { %v720_v35 = vadd.f32 %v719_v34, %v616_v24  ;;  %v962_v24 = vperm.slane %v954_v20, 0 }
 0x134   : > { %v728_v33 = vsel %vm617_vm1, %v694_v32, -inf }
 0x135   : > { %729 = vmax.xlane.f32.xlu0 %v728_v33  ;;  %v731_v36 = vsel %vm617_vm1, %v720_v35, -inf }
 0x13d   : > { %732 = vmax.xlane.f32.xlu0 %v731_v36 }
 0x19c   : > { %v724_v37 = vpop.xlane.xlu1 %723 }
 0x19d   : > { %v734_v38 = vsub.f32 %v642_v26, %v724_v37 }
 0x19f   : > { %v738_v39 = vmul.f32 1.442695, %v734_v38 }
 0x1a1   : > { %1178 = vpow2.f32 %v738_v39 }
 0x1a4   : > { %v727_v40 = vpop.xlane.xlu1 %726 }
 0x1a5   : > { %v735_v41 = vsub.f32 %v668_v29, %v727_v40 }
 0x1a7   : > { %v1179_v42 = vpop.eup %1178  ;;  %v740_v43 = vmul.f32 1.442695, %v735_v41 }
 0x1a8   : > { %v730_v44 = vpop.xlane.xlu0 %729  ;;  %v746_v45 = vsel %vm617_vm1, %v1179_v42, 0.0 }
 0x1a9   : > { %1180 = vpow2.f32 %v740_v43  ;;  %v736_v46 = vsub.f32 %v694_v32, %v730_v44  ;;  %747 = vadd.xlane.f32.xlu0 %v746_v45 }
 0x1ab   : > { %v742_v47 = vmul.f32 1.442695, %v736_v46 }
 0x1ad   : > { %1182 = vpow2.f32 %v742_v47 }
 0x1af   : > { %v1181_v48 = vpop.eup %1180 }
 0x1b0   : > { %v733_v49 = vpop.xlane.xlu0 %732  ;;  %v749_v50 = vsel %vm617_vm1, %v1181_v48, 0.0 }
 0x1b1   : > { %v737_v51 = vsub.f32 %v720_v35, %v733_v49  ;;  %750 = vadd.xlane.f32.xlu1 %v749_v50  ;;  %v994_v50 = vperm.slane %v954_v20, 1 }
 0x1b3   : > { %v1183_v52 = vpop.eup %1182  ;;  %v744_v53 = vmul.f32 1.442695, %v737_v51 }
 0x1b4   : > { %v752_v54 = vsel %vm617_vm1, %v1183_v52, 0.0 }
 0x1b5   : > { %1184 = vpow2.f32 %v744_v53  ;;  %753 = vadd.xlane.f32.xlu2 %v752_v54  ;;  %v996_v53 = vperm.slane %v954_v20, 2 }
 0x1bb   : > { %v1185_v55 = vpop.eup %1184 }
 0x1bc   : > { %v755_v56 = vsel %vm617_vm1, %v1185_v55, 0.0 }
 0x1bd   : > { %756 = vadd.xlane.f32.xlu2 %v755_v56 }
 0x21c   : > { %v748_v57 = vpop.xlane.xlu0 %747 }
 0x21d   : > { %1186 = vrcp.f32 %v748_v57 }
 0x223   : > { %v1187_v58 = vpop.eup %1186 }
 0x224   : > { %v762_v59 = vmul.f32 %v1187_v58, %v1179_v42  ;;  %v751_v60 = vpop.xlane.xlu1 %750 }
 0x225   : > { %1188 = vrcp.f32 %v751_v60 }
 0x226   : > { %1113 = vmatmul.msk.f32.vlgmr.msra.gmra.mxu0 %vm617_vm1, %v762_v59 }
 0x228   : > { %v754_v61 = vpop.xlane.xlu2 %753 }
 0x229   : > { %1190 = vrcp.f32 %v754_v61 }
 0x22b   : > { %v1189_v62 = vpop.eup %1188 }
 0x22c   : > { %v763_v63 = vmul.f32 %v1189_v62, %v1181_v48 }
 0x22e   : > { %1114 = vmatmul.msk.f32.vlgmr.msra.gmra.mxu1 %vm617_vm1, %v763_v63 }
 0x22f   : > { %v1191_v0 = vpop.eup %1190 }
 0x230   : > { %v764_v1 = vmul.f32 %v1191_v0, %v1183_v52  ;;  %v757_v2 = vpop.xlane.xlu2 %756 }
 0x231   : > { %1192 = vrcp.f32 %v757_v2 }
 0x232   : > { %1115 = vmatmul.msk.f32.vlgmr.msra.gmra.mxu2 %vm617_vm1, %v764_v1  ;;  %1194 = vrcp.f32 %v1262_v30 }
 0x237   : > { %v1193_v3 = vpop.eup %1192 }
 0x238   : > { %v765_v4 = vmul.f32 %v1193_v3, %v1185_v55  ;;  %v1195_v31 = vpop.eup %1194 }
 0x239   : > { %v969_v32 = vmul.f32 32.0, %v1195_v31  ;;  %vm973_vm2 = vweird.f32 %v1195_v31 }
 0x23a   : > { %1116 = vmatmul.msk.f32.vlgmr.msra.gmra.mxu3 %vm617_vm1, %v765_v4 }
 0x23b   : > { %v970_v33 = vsub.f32 1.0, %v969_v32 }
 0x23d   : > { %v971_v34 = vmul.f32 %v1195_v31, %v970_v33 }
 0x23f   : > { %v972_v35 = vadd.f32 %v1195_v31, %v971_v34 }
 0x241   : > { %v974_v36 = vsel %vm973_vm2, %v1195_v31, %v972_v35 }
 0x2a3   : > { %v786_v9 = vpop.f32.mrf.mxu0 }
 0x2a4   : > { %1117 = vmatmul.msk.f32.vlgmr.msrb.gmra.mxu0 %vm617_vm1, %v786_v9 }
 0x2ab   : > { %v809_v10 = vpop.f32.mrf.mxu1 }
 0x2ac   : > { %1118 = vmatmul.msk.f32.vlgmr.msrb.gmra.mxu1 %vm617_vm1, %v809_v10 }
 0x2b5   : > { %v832_v11 = vpop.f32.mrf.mxu2 }
 0x2b6   : > { %1119 = vmatmul.msk.f32.vlgmr.msrb.gmra.mxu2 %vm617_vm1, %v832_v11 }
 0x2bd   : > { %v855_v12 = vpop.f32.mrf.mxu3 }
 0x2be   : > { %1120 = vmatmul.msk.f32.vlgmr.msrb.gmra.mxu3 %vm617_vm1, %v855_v12 }
 0x321   : > { %v882_v15 = vpop.f32.mrf.mxu0 }
 0x322   : > { %v955_v18 = vsel %vm366_vm0, %v882_v15, 0.0 }
 0x329   : > { %v905_v13 = vpop.f32.mrf.mxu1 }
 0x32a   : > { %v956_v17 = vsel %vm366_vm0, %v905_v13, 0.0 }
 0x32b   : > { %v957_v21 = vadd.f32 %v956_v17, %v955_v18 }
 0x339   : > { %v928_v16 = vpop.f32.mrf.mxu2 }
 0x33a   : > { %v958_v19 = vsel %vm366_vm0, %v928_v16, 0.0 }
 0x33b   : > { %v959_v22 = vadd.f32 %v958_v19, %v957_v21 }
 0x341   : > { %v951_v23 = vpop.f32.mrf.mxu3 }
 0x342   : > { %v960_v25 = vsel %vm366_vm0, %v951_v23, 0.0 }
 0x343   : > { %v961_v26 = vadd.f32 %v960_v25, %v959_v22 }
 0x345   : > { %v963_v27 = vadd.f32 %v962_v24, %v961_v26 }
 0x347   : > { %v964_v28 = vadd.f32 %v963_v27, %v1399_v14 }
 0x349   : > { %v965_v29 = vsel %vm366_vm0, %v964_v28, 0.0 }
 0x34a   : > { %966 = vadd.xlane.f32.xlu2 %v965_v29 }
 0x3bd   : > { %v967_v37 = vpop.xlane.xlu2 %966 }
 0x3be   : > { %v975_v38 = vmul.f32 %v974_v36, %v967_v37 }
 0x3c0   : > { %v976_v39 = vsub.f32 %v964_v28, %v975_v38 }
 0x3c2   : > { %v977_v40 = vmul.f32 %v976_v39, %v976_v39 }
 0x3c4   : > { %v978_v14 = vsel %vm366_vm0, %v977_v40, 0.0 }
 0x3c5   : > { %979 = vadd.xlane.f32.xlu0 %v978_v14 }
 0x438   : > { %v980_v41 = vpop.xlane.xlu0 %979 }
 0x439   : > { %v981_v42 = vmul.f32 %v980_v41, %v974_v36 }
 0x43b   : > { %v982_v43 = vadd.f32 1e-05, %v981_v42 }
 0x43d   : > { %1196 = vrsqrt.f32 %v982_v43  ;;  %vm989_vm4 = vweird.f32 %v982_v43 }
 0x443   : > { %v1197_v44 = vpop.eup %1196 }
 0x444   : > { %v984_v45 = vmul.f32 %v1197_v44, %v982_v43  ;;  %vm990_vm3 = vweird.f32 %v1197_v44 }
 0x445   : > { %vm991_vm5 = vmor %vm989_vm4, %vm990_vm3 }
 0x446   : > { %v985_v46 = vmul.f32 %v1197_v44, %v984_v45 }
 0x448   : > { %v986_v47 = vmul.f32 0.5, %v985_v46 }
 0x44a   : > { %v987_v48 = vsub.f32 1.5, %v986_v47 }
 0x44c   : > { %v988_v49 = vmul.f32 %v1197_v44, %v987_v48 }
 0x44e   : > { %v992_v51 = vsel %vm991_vm5, %v1197_v44, %v988_v49 }
 0x44f   : > { %v993_v52 = vmul.f32 %v992_v51, %v976_v39 }
 0x451   : > { %v995_v54 = vmul.f32 %v994_v50, %v993_v52 }
 0x453   : > { %v997_v55 = vadd.f32 %v996_v53, %v995_v54 }
 0x455   : > { %998 = vst.msk [vmem:[%s257_s15] sm:$0xff] %vm366_vm0, %v997_v55 }
 0x456   : > { %1225 = shalt.err (!%p1222_p3)
}
 0x457   : > { %1126 = dma.vmem_to_hbm [thread:$0]  (%p1336_p5), %s1013_s16, 128, %s1015_s9, %s1000_s25  }
 0x458 PF: > { %p1132_p4 = scmp.ge.s32.totalorder %s1260_s24, 2  ;;  %s1026_s29 = sand.u32 1, %s1248_s21  }
 0x459   : > { %s1027_s12 = scalar_lea.sflag [#allocation3], %s1026_s29 }
 0x45a   : > { %p1129_p7 = pnand %p1132_p4, %p1340_p6 }
 0x45c   : > { %p1130_p8 = pneg %p1129_p7 }
 0x45e   : > { %1243 = dma.done.wait (%p1130_p8), %s1027_s12, 128  }
 0x45f   : > { %1245 = vsyncadd (%p1130_p8), %s1027_s12, 4294967168  ;;  %p16_p9 = scmp.ge.s32.totalorder %s1323_s27, 4   ;;  %s1649_s21 = smov %s1252_s22 }
 0x460   : > { %s1650_s22 = smov %s1256_s23  ;;  %s1651_s23 = smov %s1334_s30 }
 0x461   : > { %s1652_s24 = smov %s1323_s27  ;;  %18 = sbr.rel (!%p16_p9) target bundleno = 3 (0x3), region = 82 }
 0x466   :  { %1033 = vsyncpa [#allocation3], 1 }
 0x467   :  { %1035 = vsyncpa [#allocation3 + $0x1], 1 }

</bundles_post_ra>
